<compile_context>
chip_gen: v7x
topology: tpu7x:2x2x1
jax: 0.10.0
libtpu: 0.0.40
codegen_flags: <defaults>
</compile_context>

<pallas_src>
import functools

import jax
import jax.numpy as jnp
from jax.experimental import pallas as pl
from jax.experimental.pallas import tpu as pltpu


def _pick_bt(n):
    """Largest divisor of n that is <= 8 and leaves >= 2 batch-grid steps when
    n >= 2 (keeps v7x's second TensorCore busy; harmless on v5e/v6e)."""
    cap = min(8, max(1, n // 2))
    bt = 1
    for div in range(1, cap + 1):
        if n % div == 0:
            bt = div
    return bt


def _pick_hw_tile(hw, bt, c, itemsize, budget_bytes=16 << 20):
    """Largest lane tile (multiple of 128 dividing hw) such that
    2 inputs x 2 pipeline buffers x bt x c x tile x itemsize <= budget."""
    per_lane = 4 * bt * c * itemsize            # 2 inputs x 2 buffers
    max_tile = max(128, budget_bytes // max(per_lane, 1))
    if hw <= max_tile:
        return hw                               # single tile, full lane extent
    tile = (max_tile // 128) * 128
    while tile >= 128:
        if hw % tile == 0:
            return tile
        tile -= 128
    # No 128-aligned divisor under budget (unusual H*W): fall back to the full
    # extent; still correct, vmem_limit_bytes below is sized from the real tile.
    return hw


def _make_kernel(hw_total):
    inv_hw = 1.0 / float(hw_total)

    def kernel(e_ref, d_ref, we_ref, be_ref, wd_ref, bd_ref, wa_ref, ba_ref,
               o_ref, esum, emax, dsum, dmax):
        """One (batch tile, H*W tile) grid step.

        e_ref, d_ref : (BT, C, HW_TILE)   activation tiles (pixels on lanes)
        we_ref, wd_ref: (C, ratio)        shared 1x1-conv weights
        be_ref, bd_ref: (1, ratio)        shared 1x1-conv biases, pre-doubled
        wa_ref        : (ratio, C)        final 1x1-conv weight
        ba_ref        : (1, C)            final 1x1-conv bias
        o_ref         : (BT, C)           sigmoid attention weights
        esum/emax/dsum/dmax : (BT, C) f32 running pooling accumulators
        """
        hw = pl.program_id(1)

        @pl.when(hw == 0)
        def _():
            esum[...] = jnp.zeros_like(esum)
            dsum[...] = jnp.zeros_like(dsum)
            emax[...] = jnp.full_like(emax, -jnp.inf)
            dmax[...] = jnp.full_like(dmax, -jnp.inf)

        e = e_ref[...].astype(jnp.float32)          # accumulate in f32
        d = d_ref[...].astype(jnp.float32)
        esum[...] += jnp.sum(e, axis=-1)
        emax[...] = jnp.maximum(emax[...], jnp.max(e, axis=-1))
        dsum[...] += jnp.sum(d, axis=-1)
        dmax[...] = jnp.maximum(dmax[...], jnp.max(d, axis=-1))

        @pl.when(hw == pl.num_programs(1) - 1)
        def _():
            # adaptive_avg_pool + adaptive_max_pool (the two pooled branches share
            # the same 1x1 conv, so their sum can go through a single matmul; the
            # bias doubling is folded in the wrapper).
            e_pool = esum[...] * inv_hw + emax[...]          # (BT, C)
            d_pool = dsum[...] * inv_hw + dmax[...]
            h = (jnp.dot(e_pool, we_ref[...], preferred_element_type=jnp.float32)
                 + be_ref[...]
                 + jnp.dot(d_pool, wd_ref[...], preferred_element_type=jnp.float32)
                 + bd_ref[...])                              # (BT, ratio)
            out = (jnp.dot(h, wa_ref[...], preferred_element_type=jnp.float32)
                   + ba_ref[...])                            # (BT, C)
            o_ref[...] = jax.nn.sigmoid(out).astype(o_ref.dtype)

    return kernel


@functools.partial(jax.jit, static_argnames=("hw_tile",))
def channel_attention_forward(e, d, We_t, be, Wd_t, bd, Wa_t, ba, *, hw_tile=None):
    """ChannelAttentionBlock forward.

    e, d       : (N, C, H, W)
    We_t, Wd_t : (ratio, C)  torch-layout shared 1x1-conv weights
    be, bd     : (ratio,)    shared 1x1-conv biases
    Wa_t       : (C, ratio)  torch-layout final 1x1-conv weight
    ba         : (C,)        final 1x1-conv bias
    hw_tile    : optional forced H*W tile (testing / tuning); must divide H*W
    returns (N, C, 1, 1)
    """
    N, C, H, W = e.shape
    ratio = We_t.shape[0]
    HW = H * W
    itemsize = jnp.dtype(e.dtype).itemsize

    BT = _pick_bt(N)
    NB = N // BT
    if hw_tile is not None and HW % int(hw_tile) == 0:
        HW_TILE = int(hw_tile)
    else:
        HW_TILE = _pick_hw_tile(HW, BT, C, itemsize)
    NHW = HW // HW_TILE

    # Free reshapes only -- no HBM copies of the activations; reduction axis
    # (H*W) lands on the 128-lane axis so pooling is lane-dense loads + lane
    # reductions.
    e2 = e.reshape(N, C, HW)
    d2 = d.reshape(N, C, HW)

    # MXU-friendly weight layouts; each shared-conv bias hits both the avg and
    # the max branch, so fold the factor of 2 here (one-time tiny op).
    we = We_t.T                      # (C, ratio)
    wd = Wd_t.T
    wa = Wa_t.T                      # (ratio, C)
    be2 = (2.0 * be).reshape(1, ratio)
    bd2 = (2.0 * bd).reshape(1, ratio)
    ba2 = ba.reshape(1, C)

    # Explicit scoped-VMEM limit: 2 inputs x 2 pipeline buffers of the chosen
    # tile plus small headroom (>= 32 MiB, <= 64 MiB so it is v7x-safe).
    in_flight = 4 * BT * C * HW_TILE * itemsize
    vmem_limit = int(min(64 << 20, max(32 << 20, in_flight + (4 << 20))))

    weight_bytes = (3 * C * ratio + 2 * ratio + C) * 4
    cost = pl.CostEstimate(
        flops=int(4 * N * C * HW + 6 * N * C * ratio),
        transcendentals=int(N * C),
        bytes_accessed=int(2 * N * C * HW * itemsize + N * C * itemsize
                           + weight_bytes),
    )

    out = pl.pallas_call(
        _make_kernel(HW),
        out_shape=jax.ShapeDtypeStruct((NB, BT, C), e.dtype),
        grid_spec=pltpu.PrefetchScalarGridSpec(
            num_scalar_prefetch=0,
            grid=(NB, NHW),                       # batch tiles, then HW tiles
            in_specs=[
                pl.BlockSpec((BT, C, HW_TILE), lambda b, h: (b, 0, h)),
                pl.BlockSpec((BT, C, HW_TILE), lambda b, h: (b, 0, h)),
                pl.BlockSpec((C, ratio), lambda b, h: (0, 0)),
                pl.BlockSpec((1, ratio), lambda b, h: (0, 0)),
                pl.BlockSpec((C, ratio), lambda b, h: (0, 0)),
                pl.BlockSpec((1, ratio), lambda b, h: (0, 0)),
                pl.BlockSpec((ratio, C), lambda b, h: (0, 0)),
                pl.BlockSpec((1, C), lambda b, h: (0, 0)),
            ],
            out_specs=pl.BlockSpec((None, BT, C), lambda b, h: (b, 0, 0)),
            scratch_shapes=[
                pltpu.VMEM((BT, C), jnp.float32),   # e running sum
                pltpu.VMEM((BT, C), jnp.float32),   # e running max
                pltpu.VMEM((BT, C), jnp.float32),   # d running sum
                pltpu.VMEM((BT, C), jnp.float32),   # d running max
            ],
        ),
        compiler_params=pltpu.CompilerParams(
            dimension_semantics=("parallel", "arbitrary"),
            vmem_limit_bytes=vmem_limit,
        ),
        cost_estimate=cost,
    )(e2, d2, we, be2, wd, bd2, wa, ba2)

    return out.reshape(N, C, 1, 1)


def _reference(e, d, We_t, be, Wd_t, bd, Wa_t, ba):
    """Pure-JAX reference mirroring the PyTorch module (torch-layout weights)."""
    def conv1x1(x, w, b):             # x: (N, Cin), w: (Cout, Cin)
        return x @ w.T + b
    e_avg = conv1x1(jnp.mean(e, axis=(2, 3)), We_t, be)
    e_max = conv1x1(jnp.max(e, axis=(2, 3)), We_t, be)
    d_avg = conv1x1(jnp.mean(d, axis=(2, 3)), Wd_t, bd)
    d_max = conv1x1(jnp.max(d, axis=(2, 3)), Wd_t, bd)
    all_concat = conv1x1(e_avg + e_max + d_avg + d_max, Wa_t, ba)
    return jax.nn.sigmoid(all_concat)[:, :, None, None]


if __name__ == "__main__":
    # in_channels must be >= 16 so that ratio = in_channels // 16 >= 1.
    N, C, H, W = 2, 32, 16, 16
    ratio = C // 16

    key = jax.random.PRNGKey(0)
    ks = jax.random.split(key, 8)

    e = jax.random.normal(ks[0], (N, C, H, W), jnp.float32)
    d = jax.random.normal(ks[1], (N, C, H, W), jnp.float32)

    # PyTorch-layout 1x1-conv weights (out_ch, in_ch) after squeezing the 1x1 taps.
    We_t = jax.random.normal(ks[2], (ratio, C), jnp.float32) * 0.2   # ca_encoder_shared
    be = jax.random.normal(ks[3], (ratio,), jnp.float32) * 0.1
    Wd_t = jax.random.normal(ks[4], (ratio, C), jnp.float32) * 0.2   # ca_decoder_shared
    bd = jax.random.normal(ks[5], (ratio,), jnp.float32) * 0.1
    Wa_t = jax.random.normal(ks[6], (C, ratio), jnp.float32) * 0.2   # c_all
    ba = jax.random.normal(ks[7], (C,), jnp.float32) * 0.1

    ref = _reference(e, d, We_t, be, Wd_t, bd, Wa_t, ba)

    # 1) Default tiling (small H*W -> single HW tile per batch tile).
    out = channel_attention_forward(e, d, We_t, be, Wd_t, bd, Wa_t, ba)
    out = jax.block_until_ready(out)
    assert out.shape == (N, C, 1, 1), out.shape
    assert jnp.allclose(out, ref, atol=1e-5, rtol=1e-5), float(
        jnp.max(jnp.abs(out - ref)))

    # 2) Forced HW tiling (exercises the multi-step running-sum/max reduction path).
    out_tiled = channel_attention_forward(e, d, We_t, be, Wd_t, bd, Wa_t, ba,
                                          hw_tile=128)
    out_tiled = jax.block_until_ready(out_tiled)
    assert jnp.allclose(out_tiled, ref, atol=1e-5, rtol=1e-5), float(
        jnp.max(jnp.abs(out_tiled - ref)))

    print("KERNEL_OK")
</pallas_src>

<mosaic_0001>
module attributes {stable_mosaic.version = 11 : i64} {
  func.func @kernel(%arg0: i32, %arg1: i32, %arg2: memref<1x32x256xf32, #tpu.memory_space<vmem>>, %arg3: memref<1x32x256xf32, #tpu.memory_space<vmem>>, %arg4: memref<32x2xf32, #tpu.memory_space<vmem>>, %arg5: memref<1x2xf32, #tpu.memory_space<vmem>>, %arg6: memref<32x2xf32, #tpu.memory_space<vmem>>, %arg7: memref<1x2xf32, #tpu.memory_space<vmem>>, %arg8: memref<2x32xf32, #tpu.memory_space<vmem>>, %arg9: memref<1x32xf32, #tpu.memory_space<vmem>>, %arg10: memref<1x1x32xf32, #tpu.memory_space<vmem>>, %arg11: memref<1x32xf32, #tpu.memory_space<vmem>>, %arg12: memref<1x32xf32, #tpu.memory_space<vmem>>, %arg13: memref<1x32xf32, #tpu.memory_space<vmem>>, %arg14: memref<1x32xf32, #tpu.memory_space<vmem>>) attributes {dimension_semantics = [#tpu.dimension_semantics<parallel>, #tpu.dimension_semantics<arbitrary>], iteration_bounds = array<i64: 2, 1>, scalar_prefetch = 0 : i64, scratch_operands = 4 : i64, tpu.core_type = #tpu.core_type<tc>, window_params = [{transform_indices = @transform_0, window_bounds = array<i64: 1, 32, 256>}, {transform_indices = @transform_1, window_bounds = array<i64: 1, 32, 256>}, {pipeline_mode = #tpu.pipeline_mode<synchronous>, transform_indices = @transform_2, window_bounds = array<i64: 32, 2>}, {pipeline_mode = #tpu.pipeline_mode<synchronous>, transform_indices = @transform_3, window_bounds = array<i64: 1, 2>}, {pipeline_mode = #tpu.pipeline_mode<synchronous>, transform_indices = @transform_4, window_bounds = array<i64: 32, 2>}, {pipeline_mode = #tpu.pipeline_mode<synchronous>, transform_indices = @transform_5, window_bounds = array<i64: 1, 2>}, {pipeline_mode = #tpu.pipeline_mode<synchronous>, transform_indices = @transform_6, window_bounds = array<i64: 2, 32>}, {pipeline_mode = #tpu.pipeline_mode<synchronous>, transform_indices = @transform_7, window_bounds = array<i64: 1, 32>}, {transform_indices = @transform_8, window_bounds = array<i64: 1, 1, 32>}]} {
    %c0_i32 = arith.constant 0 : i32
    %0 = arith.cmpi eq, %arg1, %c0_i32 : i32
    %1 = arith.extui %0 : i1 to i32
    %c0_i32_0 = arith.constant 0 : i32
    %2 = arith.cmpi ne, %1, %c0_i32_0 : i32
    scf.if %2 {
      %cst_27 = arith.constant 0.000000e+00 : f32
      %24 = vector.broadcast %cst_27 : f32 to vector<1x32xf32>
      %c0_28 = arith.constant 0 : index
      %c0_29 = arith.constant 0 : index
      %25 = vector.load %arg11[%c0_28, %c0_29] : memref<1x32xf32, #tpu.memory_space<vmem>>, vector<1x32xf32>
      tpu.vector_store %arg11[%c0_28, %c0_29], %24 {strides = array<i32>} : memref<1x32xf32, #tpu.memory_space<vmem>>, vector<1x32xf32>,
      %cst_30 = arith.constant 0.000000e+00 : f32
      %26 = vector.broadcast %cst_30 : f32 to vector<1x32xf32>
      %c0_31 = arith.constant 0 : index
      %c0_32 = arith.constant 0 : index
      %27 = vector.load %arg13[%c0_31, %c0_32] : memref<1x32xf32, #tpu.memory_space<vmem>>, vector<1x32xf32>
      tpu.vector_store %arg13[%c0_31, %c0_32], %26 {strides = array<i32>} : memref<1x32xf32, #tpu.memory_space<vmem>>, vector<1x32xf32>,
      %cst_33 = arith.constant 0xFF800000 : f32
      %28 = vector.broadcast %cst_33 : f32 to vector<1x32xf32>
      %c0_34 = arith.constant 0 : index
      %c0_35 = arith.constant 0 : index
      %29 = vector.load %arg12[%c0_34, %c0_35] : memref<1x32xf32, #tpu.memory_space<vmem>>, vector<1x32xf32>
      tpu.vector_store %arg12[%c0_34, %c0_35], %28 {strides = array<i32>} : memref<1x32xf32, #tpu.memory_space<vmem>>, vector<1x32xf32>,
      %cst_36 = arith.constant 0xFF800000 : f32
      %30 = vector.broadcast %cst_36 : f32 to vector<1x32xf32>
      %c0_37 = arith.constant 0 : index
      %c0_38 = arith.constant 0 : index
      %31 = vector.load %arg14[%c0_37, %c0_38] : memref<1x32xf32, #tpu.memory_space<vmem>>, vector<1x32xf32>
      tpu.vector_store %arg14[%c0_37, %c0_38], %30 {strides = array<i32>} : memref<1x32xf32, #tpu.memory_space<vmem>>, vector<1x32xf32>,
    } else {
    }
    %c0 = arith.constant 0 : index
    %c0_1 = arith.constant 0 : index
    %c0_2 = arith.constant 0 : index
    %3 = vector.load %arg2[%c0, %c0_1, %c0_2] : memref<1x32x256xf32, #tpu.memory_space<vmem>>, vector<1x32x256xf32>
    %c0_3 = arith.constant 0 : index
    %c0_4 = arith.constant 0 : index
    %c0_5 = arith.constant 0 : index
    %4 = vector.load %arg3[%c0_3, %c0_4, %c0_5] : memref<1x32x256xf32, #tpu.memory_space<vmem>>, vector<1x32x256xf32>
    %c0_6 = arith.constant 0 : index
    %c0_7 = arith.constant 0 : index
    %5 = vector.load %arg11[%c0_6, %c0_7] : memref<1x32xf32, #tpu.memory_space<vmem>>, vector<1x32xf32>
    %cst = arith.constant dense<0.000000e+00> : vector<1x32xf32>
    %6 = vector.multi_reduction <add>, %3, %cst [2] : vector<1x32x256xf32> to vector<1x32xf32>
    %7 = arith.addf %5, %6 : vector<1x32xf32>
    %c0_8 = arith.constant 0 : index
    %c0_9 = arith.constant 0 : index
    %8 = vector.load %arg11[%c0_8, %c0_9] : memref<1x32xf32, #tpu.memory_space<vmem>>, vector<1x32xf32>
    tpu.vector_store %arg11[%c0_8, %c0_9], %7 {strides = array<i32>} : memref<1x32xf32, #tpu.memory_space<vmem>>, vector<1x32xf32>,
    %c0_10 = arith.constant 0 : index
    %c0_11 = arith.constant 0 : index
    %9 = vector.load %arg12[%c0_10, %c0_11] : memref<1x32xf32, #tpu.memory_space<vmem>>, vector<1x32xf32>
    %cst_12 = arith.constant dense<0xFF800000> : vector<1x32xf32>
    %10 = vector.multi_reduction <maximumf>, %3, %cst_12 [2] : vector<1x32x256xf32> to vector<1x32xf32>
    %11 = arith.maximumf %9, %10 : vector<1x32xf32>
    %c0_13 = arith.constant 0 : index
    %c0_14 = arith.constant 0 : index
    %12 = vector.load %arg12[%c0_13, %c0_14] : memref<1x32xf32, #tpu.memory_space<vmem>>, vector<1x32xf32>
    tpu.vector_store %arg12[%c0_13, %c0_14], %11 {strides = array<i32>} : memref<1x32xf32, #tpu.memory_space<vmem>>, vector<1x32xf32>,
    %c0_15 = arith.constant 0 : index
    %c0_16 = arith.constant 0 : index
    %13 = vector.load %arg13[%c0_15, %c0_16] : memref<1x32xf32, #tpu.memory_space<vmem>>, vector<1x32xf32>
    %cst_17 = arith.constant dense<0.000000e+00> : vector<1x32xf32>
    %14 = vector.multi_reduction <add>, %4, %cst_17 [2] : vector<1x32x256xf32> to vector<1x32xf32>
    %15 = arith.addf %13, %14 : vector<1x32xf32>
    %c0_18 = arith.constant 0 : index
    %c0_19 = arith.constant 0 : index
    %16 = vector.load %arg13[%c0_18, %c0_19] : memref<1x32xf32, #tpu.memory_space<vmem>>, vector<1x32xf32>
    tpu.vector_store %arg13[%c0_18, %c0_19], %15 {strides = array<i32>} : memref<1x32xf32, #tpu.memory_space<vmem>>, vector<1x32xf32>,
    %c0_20 = arith.constant 0 : index
    %c0_21 = arith.constant 0 : index
    %17 = vector.load %arg14[%c0_20, %c0_21] : memref<1x32xf32, #tpu.memory_space<vmem>>, vector<1x32xf32>
    %cst_22 = arith.constant dense<0xFF800000> : vector<1x32xf32>
    %18 = vector.multi_reduction <maximumf>, %4, %cst_22 [2] : vector<1x32x256xf32> to vector<1x32xf32>
    %19 = arith.maximumf %17, %18 : vector<1x32xf32>
    %c0_23 = arith.constant 0 : index
    %c0_24 = arith.constant 0 : index
    %20 = vector.load %arg14[%c0_23, %c0_24] : memref<1x32xf32, #tpu.memory_space<vmem>>, vector<1x32xf32>
    tpu.vector_store %arg14[%c0_23, %c0_24], %19 {strides = array<i32>} : memref<1x32xf32, #tpu.memory_space<vmem>>, vector<1x32xf32>,
    %c0_i32_25 = arith.constant 0 : i32
    %21 = arith.cmpi eq, %arg1, %c0_i32_25 : i32
    %22 = arith.extui %21 : i1 to i32
    %c0_i32_26 = arith.constant 0 : i32
    %23 = arith.cmpi ne, %22, %c0_i32_26 : i32
    scf.if %23 {
      %c0_27 = arith.constant 0 : index
      %c0_28 = arith.constant 0 : index
      %24 = vector.load %arg11[%c0_27, %c0_28] : memref<1x32xf32, #tpu.memory_space<vmem>>, vector<1x32xf32>
      %cst_29 = arith.constant 3.906250e-03 : f32
      %25 = vector.broadcast %cst_29 : f32 to vector<1x32xf32>
      %26 = arith.mulf %24, %25 : vector<1x32xf32>
      %c0_30 = arith.constant 0 : index
      %c0_31 = arith.constant 0 : index
      %27 = vector.load %arg12[%c0_30, %c0_31] : memref<1x32xf32, #tpu.memory_space<vmem>>, vector<1x32xf32>
      %28 = arith.addf %26, %27 : vector<1x32xf32>
      %c0_32 = arith.constant 0 : index
      %c0_33 = arith.constant 0 : index
      %29 = vector.load %arg13[%c0_32, %c0_33] : memref<1x32xf32, #tpu.memory_space<vmem>>, vector<1x32xf32>
      %cst_34 = arith.constant 3.906250e-03 : f32
      %30 = vector.broadcast %cst_34 : f32 to vector<1x32xf32>
      %31 = arith.mulf %29, %30 : vector<1x32xf32>
      %c0_35 = arith.constant 0 : index
      %c0_36 = arith.constant 0 : index
      %32 = vector.load %arg14[%c0_35, %c0_36] : memref<1x32xf32, #tpu.memory_space<vmem>>, vector<1x32xf32>
      %33 = arith.addf %31, %32 : vector<1x32xf32>
      %c0_37 = arith.constant 0 : index
      %c0_38 = arith.constant 0 : index
      %34 = vector.load %arg4[%c0_37, %c0_38] : memref<32x2xf32, #tpu.memory_space<vmem>>, vector<32x2xf32>
      %cst_39 = arith.constant dense<0.000000e+00> : vector<1x2xf32>
      %35 = tpu.matmul %28, %34, %cst_39 {dimension_numbers = #tpu.dot_dimension_numbers<[1], [0], [0], [1], [0, 0, 1, 1], [], []>} : vector<1x32xf32>, vector<32x2xf32>, vector<1x2xf32> -> vector<1x2xf32>
      %c0_40 = arith.constant 0 : index
      %c0_41 = arith.constant 0 : index
      %36 = vector.load %arg5[%c0_40, %c0_41] : memref<1x2xf32, #tpu.memory_space<vmem>>, vector<1x2xf32>
      %37 = arith.addf %35, %36 : vector<1x2xf32>
      %c0_42 = arith.constant 0 : index
      %c0_43 = arith.constant 0 : index
      %38 = vector.load %arg6[%c0_42, %c0_43] : memref<32x2xf32, #tpu.memory_space<vmem>>, vector<32x2xf32>
      %cst_44 = arith.constant dense<0.000000e+00> : vector<1x2xf32>
      %39 = tpu.matmul %33, %38, %cst_44 {dimension_numbers = #tpu.dot_dimension_numbers<[1], [0], [0], [1], [0, 0, 1, 1], [], []>} : vector<1x32xf32>, vector<32x2xf32>, vector<1x2xf32> -> vector<1x2xf32>
      %40 = arith.addf %37, %39 : vector<1x2xf32>
      %c0_45 = arith.constant 0 : index
      %c0_46 = arith.constant 0 : index
      %41 = vector.load %arg7[%c0_45, %c0_46] : memref<1x2xf32, #tpu.memory_space<vmem>>, vector<1x2xf32>
      %42 = arith.addf %40, %41 : vector<1x2xf32>
      %c0_47 = arith.constant 0 : index
      %c0_48 = arith.constant 0 : index
      %43 = vector.load %arg8[%c0_47, %c0_48] : memref<2x32xf32, #tpu.memory_space<vmem>>, vector<2x32xf32>
      %cst_49 = arith.constant dense<0.000000e+00> : vector<1x32xf32>
      %44 = tpu.matmul %42, %43, %cst_49 {dimension_numbers = #tpu.dot_dimension_numbers<[1], [0], [0], [1], [0, 0, 1, 1], [], []>} : vector<1x2xf32>, vector<2x32xf32>, vector<1x32xf32> -> vector<1x32xf32>
      %c0_50 = arith.constant 0 : index
      %c0_51 = arith.constant 0 : index
      %45 = vector.load %arg9[%c0_50, %c0_51] : memref<1x32xf32, #tpu.memory_space<vmem>>, vector<1x32xf32>
      %46 = arith.addf %44, %45 : vector<1x32xf32>
      %47 = arith.negf %46 : vector<1x32xf32>
      %48 = math.exp %47 : vector<1x32xf32>
      %cst_52 = arith.constant 1.000000e+00 : f32
      %49 = vector.broadcast %cst_52 : f32 to vector<1x32xf32>
      %50 = arith.addf %49, %48 : vector<1x32xf32>
      %51 = arith.divf %49, %50 : vector<1x32xf32>
      %c0_53 = arith.constant 0 : index
      %c0_54 = arith.constant 0 : index
      %c0_55 = arith.constant 0 : index
      %52 = vector.load %arg10[%c0_53, %c0_54, %c0_55] : memref<1x1x32xf32, #tpu.memory_space<vmem>>, vector<1x1x32xf32>
      %53 = vector.shape_cast %52 : vector<1x1x32xf32> to vector<1x32xf32>
      %54 = vector.shape_cast %51 : vector<1x32xf32> to vector<1x1x32xf32>
      tpu.vector_store %arg10[%c0_53, %c0_54, %c0_55], %54 {strides = array<i32>} : memref<1x1x32xf32, #tpu.memory_space<vmem>>, vector<1x1x32xf32>,
    } else {
    }
    return
  }
  func.func @transform_0(%arg0: i32, %arg1: i32) -> (i32, i32, i32) {
    %c0_i32 = arith.constant 0 : i32
    %c0_i32_0 = arith.constant 0 : i32
    return %arg0, %c0_i32, %arg1 : i32, i32, i32
  }
  func.func @transform_1(%arg0: i32, %arg1: i32) -> (i32, i32, i32) {
    %c0_i32 = arith.constant 0 : i32
    %c0_i32_0 = arith.constant 0 : i32
    return %arg0, %c0_i32, %arg1 : i32, i32, i32
  }
  func.func @transform_2(%arg0: i32, %arg1: i32) -> (i32, i32) {
    %c0_i32 = arith.constant 0 : i32
    %c0_i32_0 = arith.constant 0 : i32
    %c0_i32_1 = arith.constant 0 : i32
    return %c0_i32, %c0_i32_0 : i32, i32
  }
  func.func @transform_3(%arg0: i32, %arg1: i32) -> (i32, i32) {
    %c0_i32 = arith.constant 0 : i32
    %c0_i32_0 = arith.constant 0 : i32
    %c0_i32_1 = arith.constant 0 : i32
    return %c0_i32, %c0_i32_0 : i32, i32
  }
  func.func @transform_4(%arg0: i32, %arg1: i32) -> (i32, i32) {
    %c0_i32 = arith.constant 0 : i32
    %c0_i32_0 = arith.constant 0 : i32
    %c0_i32_1 = arith.constant 0 : i32
    return %c0_i32, %c0_i32_0 : i32, i32
  }
  func.func @transform_5(%arg0: i32, %arg1: i32) -> (i32, i32) {
    %c0_i32 = arith.constant 0 : i32
    %c0_i32_0 = arith.constant 0 : i32
    %c0_i32_1 = arith.constant 0 : i32
    return %c0_i32, %c0_i32_0 : i32, i32
  }
  func.func @transform_6(%arg0: i32, %arg1: i32) -> (i32, i32) {
    %c0_i32 = arith.constant 0 : i32
    %c0_i32_0 = arith.constant 0 : i32
    %c0_i32_1 = arith.constant 0 : i32
    return %c0_i32, %c0_i32_0 : i32, i32
  }
  func.func @transform_7(%arg0: i32, %arg1: i32) -> (i32, i32) {
    %c0_i32 = arith.constant 0 : i32
    %c0_i32_0 = arith.constant 0 : i32
    %c0_i32_1 = arith.constant 0 : i32
    return %c0_i32, %c0_i32_0 : i32, i32
  }
  func.func @transform_8(%arg0: i32, %arg1: i32) -> (i32, i32, i32) {
    %c0_i32 = arith.constant 0 : i32
    %c0_i32_0 = arith.constant 0 : i32
    %c0_i32_1 = arith.constant 0 : i32
    return %arg0, %c0_i32, %c0_i32_0 : i32, i32, i32
  }
}

</mosaic_0001>

<bundles_post_ra>
// kernel: channel_attention_forward.1
= control target key start
LH: loop header
LB: loop body
LE: loop exit
PB: predicated region body
PF: predicated region fallthrough
CT: control target
= control target key end

     0   :  { %13 = vsyncpa [#allocation7], 0  ;;  %s3067_s0 = inlined_call_operand.vmem [shape: f32[2,32,256], index: 0, kind: input, shape index: {}]   ;;  %s3068_s1 = inlined_call_operand.vmem [shape: f32[2,32,256], index: 1, kind: input, shape index: {}]   ;;  %s3069_s2 = inlined_call_operand.vmem [shape: f32[32,2], index: 2, kind: input, shape index: {}]   ;;  %s3070_s3 = inlined_call_operand.vmem [shape: f32[1,2], index: 3, kind: input, shape index: {}]   ;;  %s3071_s4 = inlined_call_operand.vmem [shape: f32[32,2], index: 4, kind: input, shape index: {}]   ;;  %s3072_s5 = inlined_call_operand.vmem [shape: f32[1,2], index: 5, kind: input, shape index: {}]   ;;  %s3073_s6 = inlined_call_operand.vmem [shape: f32[2,32], index: 6, kind: input, shape index: {}]   ;;  %s3074_s7 = inlined_call_operand.vmem [shape: f32[1,32], index: 7, kind: input, shape index: {}]   ;;  %s3075_s8 = inlined_call_operand.hbm [shape: f32[2,1,32], index: 8, kind: output, shape index: {}]  }
   0x1   :  { %15 = vsyncpa [#allocation7 + $0x1], 0  ;;  %s2583_s27 = smov 0   ;;  %s2585_s28 = smov 0  }
   0x2   :  { %s2587_s29 = smov 0   ;;  %s2589_s30 = smov 0  }
   0x3   :  { %s2591_s9 = smov 0   ;;  %s2593_s10 = smov 0  }
   0x4 LB: > { %s2314_s11 = sadd.s32 4294967295, %s2529_s10   ;;  %s2315_s12 = sadd.s32 4294967294, %s2529_s10   ;;  %s2529_s10 = sphi %s2593_s10, %s21_s10   ;;  %s2525_s9 = sphi %s2591_s9, %s3082_s9   ;;  %s2521_s30 = sphi %s2589_s30, %s3081_s30   ;;  %s2517_s29 = sphi %s2587_s29, %s3080_s29   ;;  %s2513_s28 = sphi %s2585_s28, %s3079_s28   ;;  %s2509_s27 = sphi %s2583_s27, %s3078_s27  }
   0x5   : > { %s33_s13 = sadd.s32 1, %s2525_s9  ;;  %s222_s14 = sadd.s32 1, %s2517_s29 }
   0x6   : > { %p35_p0 = scmp.ge.s32.totalorder %s33_s13, 2  ;;  %p232_p1 = scmp.ne.s32.totalorder %s2517_s29, %s2513_s28 }
   0x7   : > { %p233_p2 = scmp.eq.s32.totalorder %s2314_s11, 1  ;;  %p238_p3 = scmp.ne.s32.totalorder %s2513_s28, %s2509_s27 }
   0x8   : > { %s3084_s13 = smov (%p35_p0, %s33_s13), 0  ;;  %p239_p5 = scmp.eq.s32.totalorder %s2315_s12, 1 }
   0x9   : > { %p2623_p4 = por %p233_p2, %p232_p1  ;;  %s219_s16 = ssub.s32 %s2525_s9, %s3084_s13 }
   0xa   : > { %p2318_p6 = scmp.ge.s32.totalorder %s2529_s10, 1  ;;  %p220_p7 = scmp.eq.s32.totalorder %s219_s16, 0 }
   0xb   : > { %p2630_p8 = por %p239_p5, %p238_p3  ;;  %p301_p9 = scmp.lt.s32.totalorder %s2529_s10, 3 }
   0xc   : > { %s2636_s18 = scalar_select %p220_p7, %s2517_s29, %s222_s14  }
   0xd   : > { %p302_p10 = pnand %p2318_p6, %p301_p9 }
   0xe   : > { %p348_p11 = scmp.lt.s32.totalorder (!%p302_p10), %s2521_s30, 1  ;;  %v2531_v30 = vmov (!%p302_p10), 0   ;;  %v409_v33 = vlaneseq (!%p302_p10)  ;;  %v2532_v34 = vmov (!%p302_p10), 1966171168   ;;  %vm371_vm0 = vcmask (!%p302_p10), 253952   ;;  %s345_s11 = sand.u32 (!%p302_p10), 1, %s2513_s28  }
   0xf   : > { %305 = sbr.rel (%p302_p10) target bundleno = 880 (0x370), region = 52  ;;  %2445 = vset.pattern.permute.xlu0 (!%p302_p10), %v2531_v30  ;;  %2446 = vset.pattern.permute.xlu1 (!%p302_p10), %v2531_v30  ;;  %v542_v35 = vunpack.c.l.s4 (!%p302_p10), %v2532_v34  ;;  %vm2536_vm1 = vmmov (!%p302_p10), 0   ;;  %vm756_vm2 = vcmask (!%p302_p10), 130112   ;;  %vm763_vm3 = vcmask (!%p302_p10), 195712   ;;  %s2328_s12 = sshll.u32 (!%p302_p10), %s2521_s30, 4 }
  0x10   : > { %v2647_v36 = vshrl.u32 (!%p302_p10), %v409_v33, 7  ;;  %vm770_vm4 = vcmask (!%p302_p10), 261312   ;;  %vm1973_vm5 = vcmask (!%p302_p10), 261120   ;;  %vm2133_vm6 = vcmask (!%p302_p10), 1041408   ;;  %s346_s14 = scalar_lea.vmem (!%p302_p10), [#allocation6], %s345_s11  ;;  %s3019_s21 = scalar_lea.hbm (!%p302_p10), %s3075_s8, %s2328_s12 }
  0x11   : > { %v543_v37 = vunpack.c.0.s8 (!%p302_p10), %v542_v35  ;;  %vm2129_vm7 = vcmask (!%p302_p10), 15360   ;;  %s2227_s16 = sshll.u32 (!%p302_p10), %s346_s14, 4  ;;  %s2215_s22 = scalar_lea.sflag (!%p302_p10), [#allocation7], %s345_s11  ;;  %s3021_s16 = int_to_ptr.vmem [resolvable:$true] %s2227_s16 }
  0x12   : > { %v2650_v38 = vsub.s32 (!%p302_p10), 0, %v2647_v36  ;;  %v2653_v39 = vsub.s32 (!%p302_p10), 1, %v2647_v36  ;;  %v2656_v40 = vsub.s32 (!%p302_p10), 2, %v2647_v36  ;;  %v2659_v41 = vsub.s32 (!%p302_p10), 3, %v2647_v36 }
  0x13   : > { %v2662_v42 = vsub.s32 (!%p302_p10), 4, %v2647_v36  ;;  %v2665_v43 = vsub.s32 (!%p302_p10), 5, %v2647_v36  ;;  %v2668_v44 = vsub.s32 (!%p302_p10), 6, %v2647_v36  ;;  %v2671_v45 = vsub.s32 (!%p302_p10), 7, %v2647_v36 }
  0x14   : > { %v2674_v47 = vsub.s32 (!%p302_p10), %v543_v37, %v2647_v36 }
  0x16   : > { %s349_s19 = scalar_select %p348_p11, %s2521_s30, 1 }
  0x17   : > { %s2537_s30 = smov [#allocation6]  }
  0x18   : > { %s2331_s20 = sshll.u32 %s349_s19, 6  ;;  %s2455_s24 = sshll.u32 %s2537_s30, 4  ;;  %s2456_s24 = int_to_ptr.vmem [resolvable:$false] %s2455_s24 }
  0x19   : > { %s355_s23 = scalar_lea.vmem %s3067_s0, %s2331_s20  ;;  %s365_s26 = scalar_lea.vmem %s3068_s1, %s2331_s20 }
  0x1a   : > { %v376_v0 = vld [vmem:[%s355_s23] sm:$0xff]  ;;  %v377_v1 = vld [vmem:[%s355_s23 + $0x8] sm:$0xff]  ;;  %v378_v5 = vld [vmem:[%s355_s23 + $0x10] sm:$0xff]  ;;  %s2457_s25 = scalar_lea.vmem %s2456_s24, 32  ;;  %p2458_p1 = scmp.lt.s32.totalorder %s3021_s16, %s2456_s24 }
  0x1b   : > { %v380_v2 = vld [vmem:[%s355_s23 + $0x20] sm:$0xff]  ;;  %v393_v3 = vadd.f32 %v377_v1, %v376_v0  ;;  %v381_v4 = vld [vmem:[%s355_s23 + $0x28] sm:$0xff]  ;;  %v379_v6 = vld [vmem:[%s355_s23 + $0x18] sm:$0xff]  ;;  %v791_v12 = vmax.f32 %v376_v0, %v377_v1 }
  0x1c   : > { %v399_v7 = vadd.f32 %v381_v4, %v380_v2  ;;  %v382_v8 = vld [vmem:[%s355_s23 + $0x30] sm:$0xff]  ;;  %v383_v9 = vld [vmem:[%s355_s23 + $0x38] sm:$0xff]  ;;  %v396_v10 = vadd.f32 %v379_v6, %v378_v5  ;;  %v794_v13 = vmax.f32 %v378_v5, %v379_v6  ;;  %v384_v14 = vld [vmem:[%s365_s26] sm:$0xff]  ;;  %v797_v22 = vmax.f32 %v380_v2, %v381_v4  ;;  %s2451_s23 = scalar_lea.vmem %s3021_s16, 16 }
  0x1d   : > { %394 = vadd.xlane.f32.xlu0 %v393_v3  ;;  %v402_v11 = vadd.f32 %v383_v9, %v382_v8  ;;  %v385_v15 = vld [vmem:[%s365_s26 + $0x8] sm:$0xff]  ;;  %v386_v16 = vld [vmem:[%s365_s26 + $0x10] sm:$0xff]  ;;  %v387_v17 = vld [vmem:[%s365_s26 + $0x18] sm:$0xff]  ;;  %v800_v26 = vmax.f32 %v382_v8, %v383_v9  ;;  %p2452_p12 = scmp.ne.s32.totalorder %s3021_s16, %s2451_s23  ;;  %p2459_p2 = scmp.lt.s32.totalorder %s2457_s25, %s2451_s23 }
  0x1e   : > { %400 = vadd.xlane.f32.xlu1 %v399_v7  ;;  %v1180_v18 = vadd.f32 %v385_v15, %v384_v14  ;;  %v1183_v19 = vadd.f32 %v387_v17, %v386_v16  ;;  %v388_v20 = vld [vmem:[%s365_s26 + $0x20] sm:$0xff]  ;;  %v389_v21 = vld [vmem:[%s365_s26 + $0x28] sm:$0xff]  ;;  %v390_v24 = vld [vmem:[%s365_s26 + $0x30] sm:$0xff]  ;;  %v1569_v28 = vmax.f32 %v384_v14, %v385_v15  ;;  %v1572_v29 = vmax.f32 %v386_v16, %v387_v17 }
  0x1f   : > { %v1186_v23 = vadd.f32 %v389_v21, %v388_v20  ;;  %v391_v25 = vld [vmem:[%s365_s26 + $0x38] sm:$0xff]  ;;  %v1575_v31 = vmax.f32 %v388_v20, %v389_v21  ;;  %p2453_p13 = pnand %p2452_p12, %p2623_p4  ;;  %p2460_p3 = por %p2459_p2, %p2458_p1 }
  0x20   : > { %v1189_v27 = vadd.f32 %v391_v25, %v390_v24  ;;  %v1578_v32 = vmax.f32 %v390_v24, %v391_v25 }
  0x21   : > { %397 = vadd.xlane.f32.xlu0 %v396_v10  ;;  %p2454_p0 = pneg %p2453_p13 }
  0x22   : > { %403 = vadd.xlane.f32.xlu1 %v402_v11 }
  0x23   : > { %p2461_p5 = pnand %p2460_p3, %p2454_p0 }
  0x25   : > { %792 = vmax.xlane.f32.xlu0 %v791_v12 }
  0x26   : > { %795 = vmax.xlane.f32.xlu1 %v794_v13 }
  0x29   : > { %1181 = vadd.xlane.f32.xlu0 %v1180_v18 }
  0x2a   : > { %1184 = vadd.xlane.f32.xlu1 %v1183_v19 }
  0x2d   : > { %798 = vmax.xlane.f32.xlu0 %v797_v22 }
  0x2e   : > { %1187 = vadd.xlane.f32.xlu1 %v1186_v23 }
  0x31   : > { %801 = vmax.xlane.f32.xlu0 %v800_v26 }
  0x32   : > { %1190 = vadd.xlane.f32.xlu1 %v1189_v27 }
  0x35   : > { %1570 = vmax.xlane.f32.xlu0 %v1569_v28 }
  0x36   : > { %1573 = vmax.xlane.f32.xlu1 %v1572_v29 }
  0x39   : > { %1576 = vmax.xlane.f32.xlu0 %v1575_v31 }
  0x3a   : > { %1579 = vmax.xlane.f32.xlu1 %v1578_v32 }
  0xaa   : > { %v395_v46 = vpop.xlane.xlu0 %394 }
  0xab   : > { %v401_v48 = vpop.xlane.xlu1 %400  ;;  %v412_v49 = vrot.slane %v395_v46, %v2650_v38  ;;  %v416_v50 = vrot.slane %v395_v46, %v2653_v39  ;;  %v420_v51 = vrot.slane %v395_v46, %v2656_v40  ;;  %v424_v52 = vrot.slane %v395_v46, %v2659_v41 }
  0xac   : > { %v428_v53 = vrot.slane %v395_v46, %v2662_v42  ;;  %v432_v54 = vrot.slane %v395_v46, %v2665_v43  ;;  %v436_v55 = vrot.slane %v395_v46, %v2668_v44  ;;  %v440_v56 = vrot.slane %v395_v46, %v2671_v45 }
  0xad   : > { %v537_v57 = vcombine.low %v412_v49, %v416_v50  ;;  %v538_v58 = vcombine.low %v420_v51, %v424_v52  ;;  %v476_v59 = vrot.slane %v401_v48, %v2650_v38  ;;  %v480_v60 = vrot.slane %v401_v48, %v2653_v39 }
  0xae   : > { %v398_v61 = vpop.xlane.xlu0 %397  ;;  %v539_v62 = vcombine.low %v428_v53, %v432_v54  ;;  %v540_v63 = vcombine.low %v436_v55, %v440_v56  ;;  %v484_v0 = vrot.slane %v401_v48, %v2656_v40  ;;  %v488_v1 = vrot.slane %v401_v48, %v2659_v41 }
  0xaf   : > { %v2688_v2 = vpop.xlane.xlu1 %403  ;;  %v547_v3 = vrot.slane %v537_v57, %v2674_v47  ;;  %v554_v4 = vrot.slane %v538_v58, %v2674_v47  ;;  %v444_v5 = vrot.slane %v398_v61, %v2650_v38  ;;  %v448_v6 = vrot.slane %v398_v61, %v2653_v39 }
  0xb0   : > { %v561_v7 = vrot.slane %v539_v62, %v2674_v47  ;;  %v568_v8 = vrot.slane %v540_v63, %v2674_v47  ;;  %v452_v9 = vrot.slane %v398_v61, %v2656_v40  ;;  %v456_v10 = vrot.slane %v398_v61, %v2659_v41 }
  0xb1   : > { %v569_v11 = vcombine.low %v547_v3, %v554_v4  ;;  %v460_v12 = vrot.slane %v398_v61, %v2662_v42  ;;  %v464_v13 = vrot.slane %v398_v61, %v2665_v43  ;;  %v468_v14 = vrot.slane %v398_v61, %v2668_v44 }
  0xb2   : > { %v570_v15 = vcombine.low %v561_v7, %v568_v8  ;;  %v472_v16 = vrot.slane %v398_v61, %v2671_v45  ;;  %v586_v17 = vcombine.low %v444_v5, %v448_v6  ;;  %v587_v18 = vcombine.low %v452_v9, %v456_v10 }
  0xb3   : > { %v2702_v19 = vpop.xlane.xlu1 %795  ;;  %v577_v20 = vrot.slane %v569_v11, %v2674_v47  ;;  %v588_v21 = vcombine.low %v460_v12, %v464_v13  ;;  %v492_v22 = vrot.slane %v401_v48, %v2662_v42  ;;  %v496_v23 = vrot.slane %v401_v48, %v2665_v43 }
  0xb4   : > { %v584_v24 = vrot.slane %v570_v15, %v2674_v47  ;;  %v589_v25 = vcombine.low %v468_v14, %v472_v16  ;;  %v596_v26 = vrot.slane %v586_v17, %v2674_v47  ;;  %v603_v27 = vrot.slane %v587_v18, %v2674_v47 }
  0xb5   : > { %v610_v28 = vrot.slane %v588_v21, %v2674_v47  ;;  %v500_v29 = vrot.slane %v401_v48, %v2668_v44  ;;  %v504_v30 = vrot.slane %v401_v48, %v2671_v45  ;;  %v635_v31 = vcombine.low %v476_v59, %v480_v60  ;;  %v793_v60 = vpop.xlane.xlu0 %792 }
  0xb6   : > { %v585_v32 = vcombine.low %v577_v20, %v584_v24  ;;  %v617_v34 = vrot.slane %v589_v25, %v2674_v47  ;;  %v618_v35 = vcombine.low %v596_v26, %v603_v27  ;;  %v636_v37 = vcombine.low %v484_v0, %v488_v1 }
  0xb7   : > { %v637_v46 = vcombine.low %v492_v22, %v496_v23  ;;  %v638_v49 = vcombine.low %v500_v29, %v504_v30  ;;  %v645_v50 = vrot.slane %v635_v31, %v2674_v47  ;;  %v508_v51 = vrot.slane %v2688_v2, %v2650_v38  ;;  %v2717_v52 = vpop.xlane.xlu1 %1184 }
  0xb8   : > { %734 = vperm.xlu0 %2445, %v585_v32   ;;  %v619_v53 = vcombine.low %v610_v28, %v617_v34  ;;  %v626_v54 = vrot.slane %v618_v35, %v2674_v47  ;;  %v652_v48 = vrot.slane %v636_v37, %v2674_v47  ;;  %v512_v55 = vrot.slane %v2688_v2, %v2653_v39 }
  0xb9   : > { %v659_v56 = vrot.slane %v637_v46, %v2674_v47  ;;  %v666_v57 = vrot.slane %v638_v49, %v2674_v47  ;;  %v516_v58 = vrot.slane %v2688_v2, %v2656_v40  ;;  %v520_v59 = vrot.slane %v2688_v2, %v2659_v41 }
  0xba   : > { %v633_v61 = vrot.slane %v619_v53, %v2674_v47  ;;  %v667_v62 = vcombine.low %v645_v50, %v652_v48  ;;  %v524_v63 = vrot.slane %v2688_v2, %v2662_v42  ;;  %v528_v0 = vrot.slane %v2688_v2, %v2665_v43 }
  0xbb   : > { %v668_v1 = vcombine.low %v659_v56, %v666_v57  ;;  %v532_v3 = vrot.slane %v2688_v2, %v2668_v44  ;;  %v536_v4 = vrot.slane %v2688_v2, %v2671_v45  ;;  %v684_v5 = vcombine.low %v508_v51, %v512_v55  ;;  %v1188_v14 = vpop.xlane.xlu1 %1187 }
  0xbc   : > { %v634_v6 = vcombine.low %v626_v54, %v633_v61  ;;  %v675_v7 = vrot.slane %v667_v62, %v2674_v47  ;;  %v685_v8 = vcombine.low %v516_v58, %v520_v59  ;;  %v686_v9 = vcombine.low %v524_v63, %v528_v0 }
  0xbd   : > { %v682_v10 = vrot.slane %v668_v1, %v2674_v47  ;;  %v687_v11 = vcombine.low %v532_v3, %v536_v4  ;;  %v694_v12 = vrot.slane %v684_v5, %v2674_v47  ;;  %v810_v13 = vrot.slane %v793_v60, %v2650_v38 }
  0xbe   : > { %737 = vperm.xlu1 %2446, %v634_v6   ;;  %v701_v15 = vrot.slane %v685_v8, %v2674_v47  ;;  %v708_v16 = vrot.slane %v686_v9, %v2674_v47  ;;  %v814_v2 = vrot.slane %v793_v60, %v2653_v39  ;;  %v818_v17 = vrot.slane %v793_v60, %v2656_v40 }
  0xbf   : > { %v683_v18 = vcombine.low %v675_v7, %v682_v10  ;;  %v715_v20 = vrot.slane %v687_v11, %v2674_v47  ;;  %v822_v21 = vrot.slane %v793_v60, %v2659_v41  ;;  %v826_v22 = vrot.slane %v793_v60, %v2662_v42  ;;  %v1191_v8 = vpop.xlane.xlu1 %1190 }
  0xc0   : > { %v716_v23 = vcombine.low %v694_v12, %v701_v15  ;;  %v830_v24 = vrot.slane %v793_v60, %v2665_v43  ;;  %v834_v25 = vrot.slane %v793_v60, %v2668_v44  ;;  %v838_v26 = vrot.slane %v793_v60, %v2671_v45 }
  0xc1   : > { %v717_v27 = vcombine.low %v708_v16, %v715_v20  ;;  %v935_v28 = vcombine.low %v810_v13, %v814_v2  ;;  %v936_v29 = vcombine.low %v818_v17, %v822_v21  ;;  %v1263_v30 = vrot.slane %v1188_v14, %v2650_v38 }
  0xc2   : > { %740 = vperm.xlu1 %2446, %v683_v18   ;;  %v724_v31 = vrot.slane %v716_v23, %v2674_v47  ;;  %v937_v32 = vcombine.low %v826_v22, %v830_v24  ;;  %v938_v34 = vcombine.low %v834_v25, %v838_v26  ;;  %v1267_v35 = vrot.slane %v1188_v14, %v2653_v39 }
  0xc3   : > { %v731_v37 = vrot.slane %v717_v27, %v2674_v47  ;;  %v945_v46 = vrot.slane %v935_v28, %v2674_v47  ;;  %v952_v49 = vrot.slane %v936_v29, %v2674_v47  ;;  %v1271_v50 = vrot.slane %v1188_v14, %v2656_v40 }
  0xc4   : > { %v959_v51 = vrot.slane %v937_v32, %v2674_v47  ;;  %v966_v53 = vrot.slane %v938_v34, %v2674_v47  ;;  %v1275_v54 = vrot.slane %v1188_v14, %v2659_v41  ;;  %v1279_v48 = vrot.slane %v1188_v14, %v2662_v42  ;;  %v1182_v32 = vpop.xlane.xlu0 %1181 }
  0xc5   : > { %v732_v55 = vcombine.low %v724_v31, %v731_v37  ;;  %v967_v56 = vcombine.low %v945_v46, %v952_v49  ;;  %v1283_v57 = vrot.slane %v1188_v14, %v2665_v43  ;;  %v1287_v58 = vrot.slane %v1188_v14, %v2668_v44 }
  0xc6   : > { %v968_v59 = vcombine.low %v959_v51, %v966_v53  ;;  %v1291_v60 = vrot.slane %v1188_v14, %v2671_v45  ;;  %v1422_v61 = vcombine.low %v1263_v30, %v1267_v35  ;;  %v1423_v62 = vcombine.low %v1271_v50, %v1275_v54 }
  0xc7   : > { %743 = vperm.xlu1 %2446, %v732_v55   ;;  %v975_v63 = vrot.slane %v967_v56, %v2674_v47  ;;  %v1424_v0 = vcombine.low %v1279_v48, %v1283_v57  ;;  %v842_v1 = vrot.slane %v2702_v19, %v2650_v38  ;;  %v846_v3 = vrot.slane %v2702_v19, %v2653_v39 }
  0xc8   : > { %v982_v4 = vrot.slane %v968_v59, %v2674_v47  ;;  %v1425_v5 = vcombine.low %v1287_v58, %v1291_v60  ;;  %v1432_v6 = vrot.slane %v1422_v61, %v2674_v47  ;;  %v1439_v7 = vrot.slane %v1423_v62, %v2674_v47 }
  0xc9   : > { %v1446_v9 = vrot.slane %v1424_v0, %v2674_v47  ;;  %v850_v10 = vrot.slane %v2702_v19, %v2656_v40  ;;  %v854_v11 = vrot.slane %v2702_v19, %v2659_v41  ;;  %v858_v12 = vrot.slane %v2702_v19, %v2662_v42 }
  0xca   : > { %v983_v13 = vcombine.low %v975_v63, %v982_v4  ;;  %v1453_v14 = vrot.slane %v1425_v5, %v2674_v47  ;;  %v1454_v15 = vcombine.low %v1432_v6, %v1439_v7  ;;  %v862_v16 = vrot.slane %v2702_v19, %v2665_v43 }
  0xcb   : > { %v866_v2 = vrot.slane %v2702_v19, %v2668_v44  ;;  %v870_v17 = vrot.slane %v2702_v19, %v2671_v45  ;;  %v984_v18 = vcombine.low %v842_v1, %v846_v3  ;;  %v985_v20 = vcombine.low %v850_v10, %v854_v11  ;;  %v1574_v1 = vpop.xlane.xlu1 %1573 }
  0xcc   : > { %1132 = vperm.xlu1 %2446, %v983_v13   ;;  %v1455_v21 = vcombine.low %v1446_v9, %v1453_v14  ;;  %v1462_v22 = vrot.slane %v1454_v15, %v2674_v47  ;;  %v986_v23 = vcombine.low %v858_v12, %v862_v16  ;;  %v1295_v24 = vrot.slane %v1191_v8, %v2650_v38 }
  0xcd   : > { %v987_v25 = vcombine.low %v866_v2, %v870_v17  ;;  %v994_v26 = vrot.slane %v984_v18, %v2674_v47  ;;  %v1001_v27 = vrot.slane %v985_v20, %v2674_v47  ;;  %v1299_v28 = vrot.slane %v1191_v8, %v2653_v39 }
  0xce   : > { %v1469_v29 = vrot.slane %v1455_v21, %v2674_v47  ;;  %v1008_v19 = vrot.slane %v986_v23, %v2674_v47  ;;  %v1303_v30 = vrot.slane %v1191_v8, %v2656_v40  ;;  %v1307_v31 = vrot.slane %v1191_v8, %v2659_v41 }
  0xcf   : > { %v1015_v34 = vrot.slane %v987_v25, %v2674_v47  ;;  %v1016_v35 = vcombine.low %v994_v26, %v1001_v27  ;;  %v1311_v37 = vrot.slane %v1191_v8, %v2662_v42  ;;  %v1315_v46 = vrot.slane %v1191_v8, %v2665_v43 }
  0xd0   : > { %v1470_v49 = vcombine.low %v1462_v22, %v1469_v29  ;;  %v1319_v50 = vrot.slane %v1191_v8, %v2668_v44  ;;  %v1323_v51 = vrot.slane %v1191_v8, %v2671_v45  ;;  %v1471_v53 = vcombine.low %v1295_v24, %v1299_v28 }
  0xd1   : > { %v1017_v54 = vcombine.low %v1008_v19, %v1015_v34  ;;  %v1024_v48 = vrot.slane %v1016_v35, %v2674_v47  ;;  %v1472_v55 = vcombine.low %v1303_v30, %v1307_v31  ;;  %v1473_v56 = vcombine.low %v1311_v37, %v1315_v46 }
  0xd2   : > { %1527 = vperm.xlu0 %2445, %v1470_v49   ;;  %v1474_v57 = vcombine.low %v1319_v50, %v1323_v51  ;;  %v1481_v58 = vrot.slane %v1471_v53, %v2674_v47  ;;  %v1199_v59 = vrot.slane %v1182_v32, %v2650_v38  ;;  %v1203_v60 = vrot.slane %v1182_v32, %v2653_v39 }
  0xd3   : > { %v1031_v61 = vrot.slane %v1017_v54, %v2674_v47  ;;  %v1488_v62 = vrot.slane %v1472_v55, %v2674_v47  ;;  %v1495_v63 = vrot.slane %v1473_v56, %v2674_v47  ;;  %v1207_v0 = vrot.slane %v1182_v32, %v2656_v40 }
  0xd4   : > { %v1502_v3 = vrot.slane %v1474_v57, %v2674_v47  ;;  %v1211_v4 = vrot.slane %v1182_v32, %v2659_v41  ;;  %v1215_v5 = vrot.slane %v1182_v32, %v2662_v42  ;;  %v1219_v6 = vrot.slane %v1182_v32, %v2665_v43 }
  0xd5   : > { %v1032_v7 = vcombine.low %v1024_v48, %v1031_v61  ;;  %v1503_v8 = vcombine.low %v1481_v58, %v1488_v62  ;;  %v1223_v9 = vrot.slane %v1182_v32, %v2668_v44  ;;  %v1227_v10 = vrot.slane %v1182_v32, %v2671_v45  ;;  %v1580_v48 = vpop.xlane.xlu1 %1579 }
  0xd6   : > { %v1504_v11 = vcombine.low %v1495_v63, %v1502_v3  ;;  %v1324_v12 = vcombine.low %v1199_v59, %v1203_v60  ;;  %v1325_v13 = vcombine.low %v1207_v0, %v1211_v4  ;;  %v1326_v14 = vcombine.low %v1215_v5, %v1219_v6  ;;  %v799_v4 = vpop.xlane.xlu0 %798 }
  0xd7   : > { %1135 = vperm.xlu1 %2446, %v1032_v7   ;;  %v1511_v15 = vrot.slane %v1503_v8, %v2674_v47  ;;  %v1327_v16 = vcombine.low %v1223_v9, %v1227_v10  ;;  %v1620_v2 = vrot.slane %v1574_v1, %v2650_v38  ;;  %v1624_v17 = vrot.slane %v1574_v1, %v2653_v39 }
  0xd8   : > { %v1518_v18 = vrot.slane %v1504_v11, %v2674_v47  ;;  %v1334_v20 = vrot.slane %v1324_v12, %v2674_v47  ;;  %v1341_v21 = vrot.slane %v1325_v13, %v2674_v47  ;;  %v1348_v22 = vrot.slane %v1326_v14, %v2674_v47 }
  0xd9   : > { %v1355_v23 = vrot.slane %v1327_v16, %v2674_v47  ;;  %v1628_v24 = vrot.slane %v1574_v1, %v2656_v40  ;;  %v1632_v25 = vrot.slane %v1574_v1, %v2659_v41  ;;  %v1636_v26 = vrot.slane %v1574_v1, %v2662_v42 }
  0xda   : > { %v1519_v27 = vcombine.low %v1511_v15, %v1518_v18  ;;  %v1356_v28 = vcombine.low %v1334_v20, %v1341_v21  ;;  %v1640_v29 = vrot.slane %v1574_v1, %v2665_v43  ;;  %v1644_v19 = vrot.slane %v1574_v1, %v2668_v44 }
  0xdb   : > { %v1357_v30 = vcombine.low %v1348_v22, %v1355_v23  ;;  %v1648_v31 = vrot.slane %v1574_v1, %v2671_v45  ;;  %v1762_v32 = vcombine.low %v1620_v2, %v1624_v17  ;;  %v1763_v34 = vcombine.low %v1628_v24, %v1632_v25 }
  0xdc   : > { %1530 = vperm.xlu0 %2445, %v1519_v27   ;;  %v1364_v35 = vrot.slane %v1356_v28, %v2674_v47  ;;  %v1764_v37 = vcombine.low %v1636_v26, %v1640_v29  ;;  %v1231_v46 = vrot.slane %v2717_v52, %v2650_v38  ;;  %v1235_v49 = vrot.slane %v2717_v52, %v2653_v39  ;;  %v802_v28 = vpop.xlane.xlu0 %801 }
  0xdd   : > { %v1371_v50 = vrot.slane %v1357_v30, %v2674_v47  ;;  %v1765_v51 = vcombine.low %v1644_v19, %v1648_v31  ;;  %v1772_v53 = vrot.slane %v1762_v32, %v2674_v47  ;;  %v1779_v54 = vrot.slane %v1763_v34, %v2674_v47 }
  0xde   : > { %v1786_v55 = vrot.slane %v1764_v37, %v2674_v47  ;;  %v1239_v56 = vrot.slane %v2717_v52, %v2656_v40  ;;  %v1243_v57 = vrot.slane %v2717_v52, %v2659_v41  ;;  %v1247_v58 = vrot.slane %v2717_v52, %v2662_v42 }
  0xdf   : > { %v1372_v59 = vcombine.low %v1364_v35, %v1371_v50  ;;  %v1793_v60 = vrot.slane %v1765_v51, %v2674_v47  ;;  %v1794_v61 = vcombine.low %v1772_v53, %v1779_v54  ;;  %v1251_v62 = vrot.slane %v2717_v52, %v2665_v43 }
  0xe0   : > { %v1255_v63 = vrot.slane %v2717_v52, %v2668_v44  ;;  %v1259_v0 = vrot.slane %v2717_v52, %v2671_v45  ;;  %v1373_v1 = vcombine.low %v1231_v46, %v1235_v49  ;;  %v1374_v3 = vcombine.low %v1239_v56, %v1243_v57 }
  0xe1   : > { %1521 = vperm.xlu1 %2446, %v1372_v59   ;;  %v1795_v5 = vcombine.low %v1786_v55, %v1793_v60  ;;  %v1802_v6 = vrot.slane %v1794_v61, %v2674_v47  ;;  %v1375_v7 = vcombine.low %v1247_v58, %v1251_v62  ;;  %v1684_v8 = vrot.slane %v1580_v48, %v2650_v38 }
  0xe2   : > { %v1376_v9 = vcombine.low %v1255_v63, %v1259_v0  ;;  %v1383_v10 = vrot.slane %v1373_v1, %v2674_v47  ;;  %v1390_v11 = vrot.slane %v1374_v3, %v2674_v47  ;;  %v1688_v12 = vrot.slane %v1580_v48, %v2653_v39  ;;  %v1571_v0 = vpop.xlane.xlu0 %1570 }
  0xe3   : > { %v1809_v13 = vrot.slane %v1795_v5, %v2674_v47  ;;  %v1397_v52 = vrot.slane %v1375_v7, %v2674_v47  ;;  %v1692_v14 = vrot.slane %v1580_v48, %v2656_v40  ;;  %v1696_v15 = vrot.slane %v1580_v48, %v2659_v41 }
  0xe4   : > { %v1404_v16 = vrot.slane %v1376_v9, %v2674_v47  ;;  %v1405_v2 = vcombine.low %v1383_v10, %v1390_v11  ;;  %v1700_v17 = vrot.slane %v1580_v48, %v2662_v42  ;;  %v1704_v18 = vrot.slane %v1580_v48, %v2665_v43 }
  0xe5   : > { %v1810_v20 = vcombine.low %v1802_v6, %v1809_v13  ;;  %v1708_v21 = vrot.slane %v1580_v48, %v2668_v44  ;;  %v1712_v22 = vrot.slane %v1580_v48, %v2671_v45  ;;  %v1860_v23 = vcombine.low %v1684_v8, %v1688_v12 }
  0xe6   : > { %v1406_v24 = vcombine.low %v1397_v52, %v1404_v16  ;;  %v1413_v25 = vrot.slane %v1405_v2, %v2674_v47  ;;  %v1861_v26 = vcombine.low %v1692_v14, %v1696_v15  ;;  %v1862_v27 = vcombine.low %v1700_v17, %v1704_v18 }
  0xe7   : > { %1913 = vperm.xlu0 %2445, %v1810_v20   ;;  %v1863_v29 = vcombine.low %v1708_v21, %v1712_v22  ;;  %v1870_v19 = vrot.slane %v1860_v23, %v2674_v47  ;;  %v874_v30 = vrot.slane %v799_v4, %v2650_v38  ;;  %v878_v31 = vrot.slane %v799_v4, %v2653_v39 }
  0xe8   : > { %v1420_v32 = vrot.slane %v1406_v24, %v2674_v47  ;;  %v1877_v34 = vrot.slane %v1861_v26, %v2674_v47  ;;  %v1884_v35 = vrot.slane %v1862_v27, %v2674_v47  ;;  %v882_v37 = vrot.slane %v799_v4, %v2656_v40 }
  0xe9   : > { %v1891_v46 = vrot.slane %v1863_v29, %v2674_v47  ;;  %v886_v49 = vrot.slane %v799_v4, %v2659_v41  ;;  %v890_v50 = vrot.slane %v799_v4, %v2662_v42  ;;  %v894_v51 = vrot.slane %v799_v4, %v2665_v43 }
  0xea   : > { %v1421_v53 = vcombine.low %v1413_v25, %v1420_v32  ;;  %v1892_v54 = vcombine.low %v1870_v19, %v1877_v34  ;;  %v898_v48 = vrot.slane %v799_v4, %v2668_v44  ;;  %v902_v55 = vrot.slane %v799_v4, %v2671_v45  ;;  %v1577_v25 = vpop.xlane.xlu0 %1576 }
  0xeb   : > { %v1893_v56 = vcombine.low %v1884_v35, %v1891_v46  ;;  %v1033_v57 = vcombine.low %v874_v30, %v878_v31  ;;  %v1034_v58 = vcombine.low %v882_v37, %v886_v49  ;;  %v1035_v59 = vcombine.low %v890_v50, %v894_v51 }
  0xec   : > { %1524 = vperm.xlu1 %2446, %v1421_v53   ;;  %v1900_v60 = vrot.slane %v1892_v54, %v2674_v47  ;;  %v1036_v61 = vcombine.low %v898_v48, %v902_v55  ;;  %v906_v62 = vrot.slane %v802_v28, %v2650_v38  ;;  %v910_v63 = vrot.slane %v802_v28, %v2653_v39 }
  0xed   : > { %v1907_v1 = vrot.slane %v1893_v56, %v2674_v47  ;;  %v1043_v3 = vrot.slane %v1033_v57, %v2674_v47  ;;  %v1050_v5 = vrot.slane %v1034_v58, %v2674_v47  ;;  %v1057_v4 = vrot.slane %v1035_v59, %v2674_v47 }
  0xee   : > { %v1064_v6 = vrot.slane %v1036_v61, %v2674_v47  ;;  %v914_v7 = vrot.slane %v802_v28, %v2656_v40  ;;  %v918_v8 = vrot.slane %v802_v28, %v2659_v41  ;;  %v922_v9 = vrot.slane %v802_v28, %v2662_v42 }
  0xef   : > { %v1908_v10 = vcombine.low %v1900_v60, %v1907_v1  ;;  %v1065_v11 = vcombine.low %v1043_v3, %v1050_v5  ;;  %v926_v12 = vrot.slane %v802_v28, %v2665_v43  ;;  %v930_v13 = vrot.slane %v802_v28, %v2668_v44 }
  0xf0   : > { %v1066_v52 = vcombine.low %v1057_v4, %v1064_v6  ;;  %v934_v14 = vrot.slane %v802_v28, %v2671_v45  ;;  %v1082_v15 = vcombine.low %v906_v62, %v910_v63  ;;  %v1083_v16 = vcombine.low %v914_v7, %v918_v8 }
  0xf1   : > { %1919 = vperm.xlu0 %2445, %v1908_v10   ;;  %v1073_v2 = vrot.slane %v1065_v11, %v2674_v47  ;;  %v1084_v17 = vcombine.low %v922_v9, %v926_v12  ;;  %v1588_v18 = vrot.slane %v1571_v0, %v2650_v38  ;;  %v1592_v20 = vrot.slane %v1571_v0, %v2653_v39 }
  0xf2   : > { %v1080_v21 = vrot.slane %v1066_v52, %v2674_v47  ;;  %v1085_v22 = vcombine.low %v930_v13, %v934_v14  ;;  %v1092_v23 = vrot.slane %v1082_v15, %v2674_v47  ;;  %v1099_v24 = vrot.slane %v1083_v16, %v2674_v47  ;;  %v1968_v15 = vld [vmem:[%s3069_s2] sm:$0xff]  ;;  %v1969_v16 = vld [vmem:[%s3069_s2 + $0x8] sm:$0xff] }
  0xf3   : > { %v1106_v26 = vrot.slane %v1084_v17, %v2674_v47  ;;  %v1596_v27 = vrot.slane %v1571_v0, %v2656_v40  ;;  %v1600_v28 = vrot.slane %v1571_v0, %v2659_v41  ;;  %v1604_v29 = vrot.slane %v1571_v0, %v2662_v42 }
  0xf4   : > { %v1081_v19 = vcombine.low %v1073_v2, %v1080_v21  ;;  %v1113_v30 = vrot.slane %v1085_v22, %v2674_v47  ;;  %v1114_v31 = vcombine.low %v1092_v23, %v1099_v24  ;;  %v1608_v32 = vrot.slane %v1571_v0, %v2665_v43  ;;  %v2047_v22 = vld [vmem:[%s3071_s4] sm:$0xff]  ;;  %v2048_v23 = vld [vmem:[%s3071_s4 + $0x8] sm:$0xff]  ;;  %v2049_v24 = vld [vmem:[%s3071_s4 + $0x10] sm:$0xff] }
  0xf5   : > { %v1612_v34 = vrot.slane %v1571_v0, %v2668_v44  ;;  %v1616_v35 = vrot.slane %v1571_v0, %v2671_v45  ;;  %v1713_v37 = vcombine.low %v1588_v18, %v1592_v20  ;;  %v1714_v46 = vcombine.low %v1596_v27, %v1600_v28  ;;  %v1970_v18 = vld [vmem:[%s3069_s2 + $0x10] sm:$0xff]  ;;  %v1971_v20 = vld [vmem:[%s3069_s2 + $0x18] sm:$0xff] }
  0xf6   : > { %1138 = vperm.xlu1 %2446, %v1081_v19   ;;  %v1115_v49 = vcombine.low %v1106_v26, %v1113_v30  ;;  %v1122_v50 = vrot.slane %v1114_v31, %v2674_v47  ;;  %v1715_v51 = vcombine.low %v1604_v29, %v1608_v32  ;;  %v1652_v53 = vrot.slane %v1577_v25, %v2650_v38  ;;  %v2050_v26 = vld [vmem:[%s3071_s4 + $0x18] sm:$0xff] }
  0xf7   : > { %v1716_v54 = vcombine.low %v1612_v34, %v1616_v35  ;;  %v1723_v48 = vrot.slane %v1713_v37, %v2674_v47  ;;  %v1730_v55 = vrot.slane %v1714_v46, %v2674_v47  ;;  %v1656_v56 = vrot.slane %v1577_v25, %v2653_v39 }
  0xf8   : > { %v1129_v57 = vrot.slane %v1115_v49, %v2674_v47  ;;  %v1737_v58 = vrot.slane %v1715_v51, %v2674_v47  ;;  %v1660_v59 = vrot.slane %v1577_v25, %v2656_v40  ;;  %v1664_v60 = vrot.slane %v1577_v25, %v2659_v41 }
  0xf9   : > { %v1744_v61 = vrot.slane %v1716_v54, %v2674_v47  ;;  %v1745_v62 = vcombine.low %v1723_v48, %v1730_v55  ;;  %v1668_v38 = vrot.slane %v1577_v25, %v2662_v42  ;;  %v1672_v63 = vrot.slane %v1577_v25, %v2665_v43 }
  0xfa   : > { %v1130_v0 = vcombine.low %v1122_v50, %v1129_v57  ;;  %v1676_v1 = vrot.slane %v1577_v25, %v2668_v44  ;;  %v1680_v39 = vrot.slane %v1577_v25, %v2671_v45  ;;  %v1811_v3 = vcombine.low %v1652_v53, %v1656_v56 }
  0xfb   : > { %v1746_v5 = vcombine.low %v1737_v58, %v1744_v61  ;;  %v1753_v4 = vrot.slane %v1745_v62, %v2674_v47  ;;  %v1812_v6 = vcombine.low %v1660_v59, %v1664_v60  ;;  %v1813_v40 = vcombine.low %v1668_v38, %v1672_v63 }
  0xfc   : > { %1141 = vperm.xlu1 %2446, %v1130_v0   ;;  %v1814_v41 = vcombine.low %v1676_v1, %v1680_v39  ;;  %v1821_v7 = vrot.slane %v1811_v3, %v2674_v47  ;;  %v2533_v12 = vmov -inf   ;;  %v2534_v52 = vmov 0.0  }
  0xfd   : > { %v1760_v8 = vrot.slane %v1746_v5, %v2674_v47  ;;  %v1828_v42 = vrot.slane %v1812_v6, %v2674_v47  ;;  %v1835_v43 = vrot.slane %v1813_v40, %v2674_v47  ;;  %374 = vst.msk [vmem:[#allocation3] sm:$0x1] %vm371_vm0, %v2533_v12  ;;  %375 = vst.msk [vmem:[#allocation5] sm:$0x1] %vm371_vm0, %v2533_v12  ;;  %v2535_v17 = vmov 0.0|0.0   ;;  %2353 = vmatprep.mubr.msk.f32.mxu0 %vm2536_vm1, %v2534_v52 }
  0xfe   : > { %v1842_v44 = vrot.slane %v1814_v41, %v2674_v47  ;;  %372 = vst.msk [vmem:[#allocation2] sm:$0x1] %vm371_vm0, %v2534_v52  ;;  %373 = vst.msk [vmem:[#allocation4] sm:$0x1] %vm371_vm0, %v2534_v52  ;;  %v2373_v2 = vpack.c.bf16 %v1969_v16, %v1968_v15  ;;  %2372 = vmatprep.subr.bf16.mxu0 %v2535_v17  ;;  %2378 = vmatprep.subr.bf16.mxu1 %v2535_v17  ;;  %v746_v28 = vand.u32 127, %v409_v33 }
  0xff   : > { %v1761_v9 = vcombine.low %v1753_v4, %v1760_v8  ;;  %v1843_v45 = vcombine.low %v1821_v7, %v1828_v42  ;;  %v2376_v21 = vpack.c.bf16 %v1971_v20, %v1970_v18  ;;  %2364 = vmatprep.mubr.msk.f32.mxu1 %vm2536_vm1, %v2534_v52  ;;  %v2379_v25 = vpack.c.bf16 %v2048_v23, %v2047_v22 }
 0x100   : > { %v1844_v10 = vcombine.low %v1835_v43, %v1842_v44  ;;  %2374 = vmatpush3.bf16.msra.mxu0 %v2373_v2  ;;  %v2382_v27 = vpack.c.bf16 %v2050_v26, %v2049_v24  ;;  %v751_v29 = vadd.s32 4294967288, %v746_v28  ;;  %v758_v19 = vadd.s32 4294967280, %v746_v28 }
 0x101   : > { %1910 = vperm.xlu1 %2446, %v1761_v9   ;;  %v1851_v11 = vrot.slane %v1843_v45, %v2674_v47  ;;  %2375 = vmatprep.subr.bf16.mxu0 %v2535_v17  ;;  %v765_v32 = vadd.s32 4294967272, %v746_v28  ;;  %v749_v35 = vsub.s32 %v746_v28, %v2647_v36 }
 0x102   : > { %v1858_v13 = vrot.slane %v1844_v10, %v2674_v47  ;;  %2380 = vmatpush3.bf16.msra.mxu1 %v2379_v25  ;;  %v754_v31 = vsub.s32 %v751_v29, %v2647_v36  ;;  %v2968_v34 = vsub.s32 %v758_v19, %v2647_v36 }
 0x103   : > { %2381 = vmatprep.subr.bf16.mxu1 %v2535_v17  ;;  %v768_v50 = vsub.s32 %v765_v32, %v2647_v36 }
 0x104   : > { %v1859_v14 = vcombine.low %v1851_v11, %v1858_v13  ;;  %2377 = vmatpush3.bf16.msra.mxu0 %v2376_v21  ;;  %v790_v2 = vld [vmem:[#allocation3] sm:$0x1] }
 0x105   : > { %2367 = vmatprep.subr.mxu0 %v2534_v52  ;;  %v392_v58 = vld [vmem:[#allocation2] sm:$0x1]  ;;  %v1179_v7 = vld [vmem:[#allocation4] sm:$0x1] }
 0x106   : > { %1916 = vperm.xlu1 %2446, %v1859_v14   ;;  %2383 = vmatpush3.bf16.msra.mxu1 %v2382_v27 }
 0x137   : > { %v735_v46 = vpop.permute.xlu0 %734 }
 0x138   : > { %v750_v33 = vrot.slane %v735_v46, %v749_v35 }
 0x13d   : > { %v738_v30 = vpop.permute.xlu1 %737 }
 0x13e   : > { %v755_v49 = vrot.slane %v738_v30, %v754_v31 }
 0x140   : > { %v757_v54 = vsel %vm756_vm2, %v755_v49, %v750_v33 }
 0x141   : > { %v741_v37 = vpop.permute.xlu1 %740 }
 0x142   : > { %v762_v51 = vrot.slane %v741_v37, %v2968_v34 }
 0x144   : > { %v764_v55 = vsel %vm763_vm3, %v762_v51, %v757_v54 }
 0x146   : > { %v744_v53 = vpop.permute.xlu1 %743 }
 0x147   : > { %v769_v48 = vrot.slane %v744_v53, %v768_v50  ;;  %v2127_v53 = vld [vmem:[%s3073_s6] sm:$0x3] }
 0x149   : > { %v771_v56 = vsel %vm770_vm4, %v769_v48, %v764_v55  ;;  %v1972_v48 = vld [vmem:[%s3070_s3] sm:$0x1] }
 0x14a   : > { %v778_v57 = vrot.slane %v771_v56, %v2674_v47 }
 0x14b   : > { %v1133_v60 = vpop.permute.xlu1 %1132 }
 0x14c   : > { %v785_v59 = vrot.slane %v778_v57, %v2674_v47  ;;  %v1146_v45 = vrot.slane %v1133_v60, %v749_v35 }
 0x14e   : > { %v787_v36 = vadd.f32 %v785_v59, %v392_v58 }
 0x150   : > { %789 = vst.msk [vmem:[#allocation2] sm:$0x1] %vm371_vm0, %v787_v36  ;;  %v2128_v36 = vld [vmem:[%s3074_s7] sm:$0x1] }
 0x151   : > { %v1528_v62 = vpop.permute.xlu0 %1527 }
 0x152   : > { %v1544_v63 = vrot.slane %v1528_v62, %v2968_v34 }
 0x156   : > { %v1136_v61 = vpop.permute.xlu1 %1135 }
 0x157   : > { %v1150_v44 = vrot.slane %v1136_v61, %v754_v31  ;;  %v1960_v29 = vld [vmem:[#allocation2] sm:$0x1] }
 0x158   : > { %v1961_v32 = vmul.f32 0.00390625, %v1960_v29 }
 0x159   : > { %v1151_v11 = vsel %vm756_vm2, %v1150_v44, %v1146_v45 }
 0x15b   : > { %v1531_v0 = vpop.permute.xlu0 %1530 }
 0x15c   : > { %v1549_v39 = vrot.slane %v1531_v0, %v768_v50 }
 0x160   : > { %v1522_v38 = vpop.permute.xlu1 %1521 }
 0x161   : > { %v1535_v3 = vrot.slane %v1522_v38, %v749_v35 }
 0x166   : > { %v1914_v14 = vpop.permute.xlu0 %1913 }
 0x167   : > { %v1928_v18 = vrot.slane %v1914_v14, %v754_v31 }
 0x16b   : > { %v1525_v1 = vpop.permute.xlu1 %1524 }
 0x16c   : > { %v1539_v5 = vrot.slane %v1525_v1, %v754_v31  ;;  %v1568_v31 = vld [vmem:[#allocation5] sm:$0x1] }
 0x16e   : > { %v1540_v4 = vsel %vm756_vm2, %v1539_v5, %v1535_v3 }
 0x16f   : > { %v1545_v6 = vsel %vm763_vm3, %v1544_v63, %v1540_v4 }
 0x170   : > { %v1550_v40 = vsel %vm770_vm4, %v1549_v39, %v1545_v6  ;;  %v1920_v24 = vpop.permute.xlu0 %1919 }
 0x171   : > { %v1557_v41 = vrot.slane %v1550_v40, %v2674_v47  ;;  %v1938_v27 = vrot.slane %v1920_v24, %v768_v50 }
 0x173   : > { %v1564_v8 = vrot.slane %v1557_v41, %v2674_v47 }
 0x175   : > { %v1139_v42 = vpop.permute.xlu1 %1138  ;;  %v1566_v43 = vadd.f32 %v1564_v8, %v1179_v7 }
 0x176   : > { %v1155_v9 = vrot.slane %v1139_v42, %v2968_v34 }
 0x177   : > { %1567 = vst.msk [vmem:[#allocation4] sm:$0x1] %vm371_vm0, %v1566_v43 }
 0x178   : > { %v1156_v13 = vsel %vm763_vm3, %v1155_v9, %v1151_v11 }
 0x17b   : > { %v1142_v10 = vpop.permute.xlu1 %1141 }
 0x17c   : > { %v1160_v12 = vrot.slane %v1142_v10, %v768_v50 }
 0x17e   : > { %v1161_v15 = vsel %vm770_vm4, %v1160_v12, %v1156_v13 }
 0x17f   : > { %v1168_v16 = vrot.slane %v1161_v15, %v2674_v47 }
 0x180   : > { %v1911_v17 = vpop.permute.xlu1 %1910 }
 0x181   : > { %v1175_v20 = vrot.slane %v1168_v16, %v2674_v47  ;;  %v1924_v21 = vrot.slane %v1911_v17, %v749_v35 }
 0x183   : > { %v1177_v22 = vmax.f32 %v790_v2, %v1175_v20  ;;  %v1929_v23 = vsel %vm756_vm2, %v1928_v18, %v1924_v21 }
 0x185   : > { %1178 = vst.msk [vmem:[#allocation3] sm:$0x1] %vm371_vm0, %v1177_v22  ;;  %v1917_v25 = vpop.permute.xlu1 %1916 }
 0x186   : > { %v1933_v26 = vrot.slane %v1917_v25, %v2968_v34  ;;  %v1964_v34 = vld [vmem:[#allocation4] sm:$0x1] }
 0x187   : > { %v1965_v50 = vmul.f32 0.00390625, %v1964_v34 }
 0x188   : > { %v1934_v28 = vsel %vm763_vm3, %v1933_v26, %v1929_v23 }
 0x189   : > { %v1939_v19 = vsel %vm770_vm4, %v1938_v27, %v1934_v28 }
 0x18a   : > { %v1946_v30 = vrot.slane %v1939_v19, %v2674_v47 }
 0x18c   : > { %v1953_v35 = vrot.slane %v1946_v30, %v2674_v47  ;;  %v1962_v37 = vld [vmem:[#allocation3] sm:$0x1] }
 0x18d   : > { %v1963_v46 = vadd.f32 %v1962_v37, %v1961_v32 }
 0x18e   : > { %v1955_v49 = vmax.f32 %v1568_v31, %v1953_v35 }
 0x18f   : > { %2354 = vmatmul.mubr.msk.f32.vlgmr.msra.gmra.mrb[0].mxu0 %vm1973_vm5, %v1963_v46 }
 0x190   : > { %1956 = vst.msk [vmem:[#allocation5] sm:$0x1] %vm371_vm0, %v1955_v49  ;;  %2369 = vmatprep.mubr.msk.f32.mxu0 %vm2536_vm1, %v2534_v52  ;;  %2368 = vmatpush3.msk.msra.mxu0 %vm2133_vm6, %v2127_v53  ;;  %v2125_v52 = vld [vmem:[%s3072_s5] sm:$0x1] }
 0x197   : > { %v1966_v51 = vld [vmem:[#allocation5] sm:$0x1] }
 0x198   : > { %v1967_v33 = vadd.f32 %v1966_v51, %v1965_v50 }
 0x19a   : > { %2365 = vmatmul.mubr.msk.f32.vlgmr.msra.gmra.mrb[0].mxu1 %vm1973_vm5, %v1967_v33 }
 0x262   : > { %v2043_v47 = vpop.f32.mrb[0].mxu0 }
 0x263   : > { %v2355_v54 = vpop.f32.mrb[1].mxu0  ;;  %v2044_v55 = vadd.f32 %v2043_v47, %v1972_v48 }
 0x26d   : > { %v2120_v56 = vpop.f32.mrb[0].mxu1 }
 0x26e   : > { %v2124_v57 = vadd.f32 %v2120_v56, %v2044_v55  ;;  %v2366_v58 = vpop.f32.mrb[1].mxu1 }
 0x270   : > { %v2126_v59 = vadd.f32 %v2125_v52, %v2124_v57 }
 0x272   : > { %2370 = vmatmul.mubr.msk.f32.vlgmr.msra.gmra.mrb[2].mxu0 %vm2129_vm7, %v2126_v59 }
 0x345   : > { %v2203_v60 = vpop.f32.mrb[2].mxu0 }
 0x346   : > { %v2204_v61 = vadd.f32 %v2203_v60, %v2128_v36  ;;  %v2371_v62 = vpop.f32.mrb[3].mxu0 }
 0x348   : > { %v2327_v38 = vmul.f32 -1.442695, %v2204_v61 }
 0x34a   : > { %2447 = vpow2.f32 %v2327_v38 }
 0x354   : > { %v2448_v63 = vpop.eup %2447 }
 0x355   : > { %v2210_v0 = vadd.f32 1.0, %v2448_v63 }
 0x357   : > { %2449 = vrcp.f32 %v2210_v0 }
 0x361   : > { %v2450_v1 = vpop.eup %2449 }
 0x362   : > { %2213 = vst.msk [vmem:[%s346_s14] sm:$0x1] %vm371_vm0, %v2450_v1 }
 0x363   : > { %2464 = shalt.err (!%p2461_p5)
}
 0x364   : > { %s2465_s26 = scalar_lea.hbm %s3019_s21, 16  ;;  %s2469_s14 = scalar_lea.hbm %s3075_s8, 32 }
 0x365   : > { %p2466_p6 = scmp.ne.s32.totalorder %s3019_s21, %s2465_s26  ;;  %p2470_p10 = scmp.lt.u32.totalorder %s3019_s21, %s3075_s8 }
 0x366   : > { %p2471_p11 = scmp.lt.u32.totalorder %s2469_s14, %s2465_s26  ;;  %p2473_p13 = scmp.lt.u32.totalorder %s2465_s26, %s3019_s21 }
 0x367   : > { %p2467_p7 = pnand %p2466_p6, %p2623_p4 }
 0x368   : > { %p2472_p12 = por %p2471_p11, %p2470_p10 }
 0x369   : > { %p2468_p9 = pneg %p2467_p7 }
 0x36a   : > { %p2474_p0 = por %p2473_p13, %p2472_p12 }
 0x36c   : > { %p2475_p1 = pnand %p2474_p0, %p2468_p9 }
 0x36e   : > { %2478 = shalt.err (!%p2475_p1)
}
 0x36f   : > { %2384 = dma.vmem_to_hbm [thread:$0]  (%p2623_p4), %s3021_s16, 16, %s3019_s21, %s2215_s22  }
 0x370 PF: > { %p2390_p2 = scmp.ge.s32.totalorder %s2529_s10, 2  ;;  %s2239_s23 = sand.u32 1, %s2509_s27  }
 0x371   : > { %s2240_s30 = scalar_lea.sflag [#allocation7], %s2239_s23 }
 0x372   : > { %p2387_p3 = pnand %p2390_p2, %p2630_p8 }
 0x374   : > { %2504 = dma.done.wait (!%p2387_p3), %s2240_s30, 16  }
 0x375   : > { %2506 = vsyncadd (!%p2387_p3), %s2240_s30, 4294967280  ;;  %s21_s10 = sadd.s32 1, %s2529_s10   ;;  %s3078_s27 = smov %s2513_s28 }
 0x376   : > { %p18_p5 = scmp.ge.s32.totalorder %s21_s10, 4   ;;  %s3079_s28 = smov %s2517_s29 }
 0x377   : > { %s3080_s29 = smov %s2636_s18  ;;  %s3081_s30 = smov %s2525_s9 }
 0x378   : > { %s3082_s9 = smov %s3084_s13  ;;  %20 = sbr.rel (!%p18_p5) target bundleno = 4 (0x4), region = 98 }
 0x37f   :  { %2244 = vsyncpa [#allocation7], 1 }
 0x380   :  { %2246 = vsyncpa [#allocation7 + $0x1], 1 }

</bundles_post_ra>
